<compile_context>
chip_gen: v5e
topology: v5e:2x2
jax: 0.10.0
libtpu: 0.0.40
codegen_flags: <defaults>
</compile_context>

<pallas_src>
import functools

import jax
import jax.numpy as jnp
from jax import lax
from jax.experimental import pallas as pl
from jax.experimental.pallas import tpu as pltpu

EXPANSION = 4
_LANE = 128

_VMEM = pl.BlockSpec(memory_space=pltpu.MemorySpace.VMEM)


def _round_up(x, m):
    return (x + m - 1) // m * m


# ----------------------------------------------------------------------------
# Pallas kernels
# ----------------------------------------------------------------------------
def _mm_fused_kernel(a_ref, w_ref, s_ref, b_ref, *rest, relu, has_res):
    """out = act((A @ W) * scale + bias [+ residual]); full K in one block."""
    if has_res:
        res_ref, o_ref = rest
    else:
        (o_ref,) = rest
    acc = jnp.dot(a_ref[...], w_ref[...], preferred_element_type=jnp.float32)
    out = acc * s_ref[...] + b_ref[...]
    if has_res:
        out = out + res_ref[...].astype(jnp.float32)
    if relu:
        out = jnp.maximum(out, 0.0)
    o_ref[...] = out.astype(o_ref.dtype)


def _conv3x3_kernel(x_ref, w_ref, s_ref, b_ref, o_ref, *, relu):
    """Fused 3x3 conv (+BN +ReLU): im2col done in-VMEM via 9 shifted dots.

    x_ref: [B, H+2, W+2, Cp]  (spatially padded, channel-padded, bf16)
    w_ref: [9, Cp, Np]        (kh-major, kw-minor)
    o_ref: [B*H*W, Np]
    """
    B, Hp, Wp, C = x_ref.shape
    H, W = Hp - 2, Wp - 2
    N = o_ref.shape[-1]
    x = x_ref[...]
    acc = jnp.zeros((B * H * W, N), jnp.float32)
    for kh in range(3):
        for kw in range(3):
            win = x[:, kh:kh + H, kw:kw + W, :].reshape(B * H * W, C)
            acc = acc + jnp.dot(win, w_ref[kh * 3 + kw],
                                preferred_element_type=jnp.float32)
    out = acc * s_ref[...] + b_ref[...]
    if relu:
        out = jnp.maximum(out, 0.0)
    o_ref[...] = out.astype(o_ref.dtype)


# ----------------------------------------------------------------------------
# Pallas wrappers
# ----------------------------------------------------------------------------
def mm_fused(a, w, scale, bias, residual=None, relu=False,
             out_dtype=jnp.bfloat16):
    """Fused (A @ W) * scale + bias (+ residual) (+ ReLU).

    K and N must already be padded to multiples of 128 (caller keeps channels
    lane-padded through the whole block). Single K step (full-K block).
    """
    M, K = a.shape
    Kw, N = w.shape
    assert K == Kw and K % _LANE == 0 and N % _LANE == 0

    if M <= 1024:
        Mp = _round_up(M, 8)
        tm = Mp
    else:
        Mp = _round_up(M, 256)
        tm = 256
    tn = 256 if N % 256 == 0 else 128

    a_p = a if Mp == M else jnp.pad(a, ((0, Mp - M), (0, 0)))
    has_res = residual is not None

    inputs = [a_p.astype(jnp.bfloat16), w.astype(jnp.bfloat16),
              scale.reshape(1, N).astype(jnp.float32),
              bias.reshape(1, N).astype(jnp.float32)]
    in_specs = [
        pl.BlockSpec((tm, K), lambda i, j: (i, 0)),
        pl.BlockSpec((K, tn), lambda i, j: (0, j)),
        pl.BlockSpec((1, tn), lambda i, j: (0, j)),
        pl.BlockSpec((1, tn), lambda i, j: (0, j)),
    ]
    if has_res:
        r = residual if Mp == M else jnp.pad(residual, ((0, Mp - M), (0, 0)))
        inputs.append(r.astype(jnp.bfloat16))
        in_specs.append(pl.BlockSpec((tm, tn), lambda i, j: (i, j)))

    out = pl.pallas_call(
        functools.partial(_mm_fused_kernel, relu=relu, has_res=has_res),
        out_shape=jax.ShapeDtypeStruct((Mp, N), out_dtype),
        grid_spec=pltpu.PrefetchScalarGridSpec(
            num_scalar_prefetch=0,
            grid=(Mp // tm, N // tn),
            in_specs=in_specs,
            out_specs=pl.BlockSpec((tm, tn), lambda i, j: (i, j)),
        ),
        compiler_params=pltpu.CompilerParams(
            dimension_semantics=("parallel", "parallel"),
            vmem_limit_bytes=32 << 20),
    )(*inputs)
    return out[:M] if Mp != M else out


def conv3x3_bn(x, p, stride=1, relu=True):
    """3x3 / pad-1 conv + fused BN (+ReLU); im2col fused in-kernel.

    Assumes the (small) padded activation fits in VMEM, which holds for the
    block sizes exercised here.
    """
    B, H, W, C = x.shape
    N = p['w'].shape[-1]
    xp = jnp.pad(x, ((0, 0), (1, 1), (1, 1), (0, 0)))
    out = pl.pallas_call(
        functools.partial(_conv3x3_kernel, relu=relu),
        out_shape=jax.ShapeDtypeStruct((B * H * W, N), jnp.bfloat16),
        in_specs=[_VMEM, _VMEM, _VMEM, _VMEM],
        out_specs=_VMEM,
        compiler_params=pltpu.CompilerParams(vmem_limit_bytes=32 << 20),
    )(xp.astype(jnp.bfloat16), p['w'],
      p['scale'].reshape(1, N), p['bias'].reshape(1, N))
    out = out.reshape(B, H, W, N)
    if stride > 1:
        # TODO(synk): stride>1 computes the full-resolution conv in-kernel and
        # subsamples afterwards (same result as a strided conv, extra compute).
        out = out[:, ::stride, ::stride, :]
    return out


# ----------------------------------------------------------------------------
# Parameters (deterministic init; BN fused in inference mode)
# ----------------------------------------------------------------------------
class KeyGen:
    def __init__(self, key):
        self.key = key

    def __call__(self):
        self.key, sub = jax.random.split(self.key)
        return sub


def _init_bn(kg, c, eps=1e-5):
    gamma = 1.0 + 0.1 * jax.random.normal(kg(), (c,))
    beta = 0.1 * jax.random.normal(kg(), (c,))
    mean = 0.1 * jax.random.normal(kg(), (c,))
    var = jnp.abs(1.0 + 0.1 * jax.random.normal(kg(), (c,)))
    scale = gamma / jnp.sqrt(var + eps)
    bias = beta - mean * scale
    return scale.astype(jnp.float32), bias.astype(jnp.float32)


def init_bottleneck_raw(kg, in_planes, planes, stride):
    """Raw f32 parameters (also used by the pure-JAX reference)."""
    p4 = EXPANSION * planes
    raw = {'stride': stride, 'in_planes': in_planes, 'planes': planes}
    raw['w1'] = (jax.random.normal(kg(), (in_planes, planes))
                 * jnp.sqrt(2.0 / in_planes)).astype(jnp.float32)
    raw['s1'], raw['b1'] = _init_bn(kg, planes)
    raw['w2'] = (jax.random.normal(kg(), (3, 3, planes, planes))
                 * jnp.sqrt(2.0 / (9 * planes))).astype(jnp.float32)
    raw['s2'], raw['b2'] = _init_bn(kg, planes)
    raw['w3'] = (jax.random.normal(kg(), (planes, p4))
                 * jnp.sqrt(2.0 / planes)).astype(jnp.float32)
    raw['s3'], raw['b3'] = _init_bn(kg, p4)
    if stride != 1 or in_planes != p4:
        raw['ws'] = (jax.random.normal(kg(), (in_planes, p4))
                     * jnp.sqrt(2.0 / in_planes)).astype(jnp.float32)
        raw['ss'], raw['bs'] = _init_bn(kg, p4)
    return raw


def _pad_mat(w, kp, np_):
    k, n = w.shape
    return jnp.pad(w, ((0, kp - k), (0, np_ - n))).astype(jnp.bfloat16)


def _pad_vec(v, np_):
    return jnp.pad(v, (0, np_ - v.shape[0])).astype(jnp.float32)


def prepare_params(raw):
    """Pad channels to multiples of 128, cast weights to bf16."""
    in_planes, planes = raw['in_planes'], raw['planes']
    p4 = EXPANSION * planes
    cin_p = _round_up(in_planes, _LANE)
    pl_p = _round_up(planes, _LANE)
    p4_p = _round_up(p4, _LANE)

    prm = {'stride': raw['stride'], 'in_planes': in_planes,
           'in_planes_p': cin_p, 'out_channels': p4}
    prm['conv1'] = {'w': _pad_mat(raw['w1'], cin_p, pl_p),
                    'scale': _pad_vec(raw['s1'], pl_p),
                    'bias': _pad_vec(raw['b1'], pl_p)}
    w2 = jnp.pad(raw['w2'], ((0, 0), (0, 0),
                             (0, pl_p - planes), (0, pl_p - planes)))
    prm['conv2'] = {'w': w2.reshape(9, pl_p, pl_p).astype(jnp.bfloat16),
                    'scale': _pad_vec(raw['s2'], pl_p),
                    'bias': _pad_vec(raw['b2'], pl_p)}
    prm['conv3'] = {'w': _pad_mat(raw['w3'], pl_p, p4_p),
                    'scale': _pad_vec(raw['s3'], p4_p),
                    'bias': _pad_vec(raw['b3'], p4_p)}
    if 'ws' in raw:
        prm['shortcut'] = {'w': _pad_mat(raw['ws'], cin_p, p4_p),
                           'scale': _pad_vec(raw['ss'], p4_p),
                           'bias': _pad_vec(raw['bs'], p4_p)}
    return prm


# ----------------------------------------------------------------------------
# Forward pass (Pallas)
# ----------------------------------------------------------------------------
def bottleneck_forward(prm, x_nchw):
    x = jnp.transpose(x_nchw, (0, 2, 3, 1)).astype(jnp.float32)   # NCHW -> NHWC
    B, H, W, cin = x.shape
    cin_p = prm['in_planes_p']
    x = jnp.pad(x, ((0, 0), (0, 0), (0, 0), (0, cin_p - cin)))
    x = x.astype(jnp.bfloat16)
    stride = prm['stride']

    # conv1 (1x1) + bn1 + relu
    p1 = prm['conv1']
    o = mm_fused(x.reshape(B * H * W, cin_p), p1['w'], p1['scale'], p1['bias'],
                 relu=True)
    o = o.reshape(B, H, W, -1)

    # conv2 (3x3, stride) + bn2 + relu  (im2col fused in-kernel)
    o = conv3x3_bn(o, prm['conv2'], stride=stride, relu=True)
    Bo, Ho, Wo, cp = o.shape

    # shortcut branch
    if 'shortcut' in prm:
        ps = prm['shortcut']
        xs = x[:, ::stride, ::stride, :]
        sc = mm_fused(xs.reshape(Bo * Ho * Wo, cin_p),
                      ps['w'], ps['scale'], ps['bias'], relu=False)
    else:
        sc = x.reshape(B * H * W, cin_p)

    # conv3 (1x1) + bn3 + residual add + relu, all fused in one kernel
    p3 = prm['conv3']
    o = mm_fused(o.reshape(Bo * Ho * Wo, cp), p3['w'], p3['scale'], p3['bias'],
                 residual=sc, relu=True)

    cout = prm['out_channels']
    o = o.reshape(Bo, Ho, Wo, -1)[..., :cout].astype(jnp.float32)
    return jnp.transpose(o, (0, 3, 1, 2))                          # NHWC -> NCHW


# ----------------------------------------------------------------------------
# Pure-JAX f32 reference (matches PyTorch semantics with fused BN stats)
# ----------------------------------------------------------------------------
def bottleneck_ref(raw, x_nchw):
    x = jnp.transpose(x_nchw, (0, 2, 3, 1)).astype(jnp.float32)
    stride = raw['stride']

    def bn(y, s, b):
        return y * s + b

    o = jax.nn.relu(bn(jnp.einsum('bhwc,cn->bhwn', x, raw['w1']),
                       raw['s1'], raw['b1']))
    o = lax.conv_general_dilated(o, raw['w2'], (stride, stride),
                                 [(1, 1), (1, 1)],
                                 dimension_numbers=('NHWC', 'HWIO', 'NHWC'))
    o = jax.nn.relu(bn(o, raw['s2'], raw['b2']))
    o = bn(jnp.einsum('bhwc,cn->bhwn', o, raw['w3']), raw['s3'], raw['b3'])
    if 'ws' in raw:
        xs = x[:, ::stride, ::stride, :]
        sc = bn(jnp.einsum('bhwc,cn->bhwn', xs, raw['ws']),
                raw['ss'], raw['bs'])
    else:
        sc = x
    o = jax.nn.relu(o + sc)
    return jnp.transpose(o, (0, 3, 1, 2))


# ----------------------------------------------------------------------------
if __name__ == "__main__":
    base = jax.random.PRNGKey(0)
    B, Hs, Ws = 2, 16, 16
    configs = [
        dict(in_planes=32, planes=16, stride=1),   # projection shortcut (channels)
        dict(in_planes=64, planes=16, stride=1),   # identity shortcut
        dict(in_planes=32, planes=16, stride=2),   # strided projection shortcut
    ]

    for idx, cfg in enumerate(configs):
        kg = KeyGen(jax.random.fold_in(base, idx))
        raw = init_bottleneck_raw(kg, cfg['in_planes'], cfg['planes'],
                                  cfg['stride'])
        prm = prepare_params(raw)

        x = jax.random.normal(jax.random.fold_in(base, 1000 + idx),
                              (B, cfg['in_planes'], Hs, Ws), dtype=jnp.float32)

        out = bottleneck_forward(prm, x)
        jax.block_until_ready(out)

        ho = (Hs - 1) // cfg['stride'] + 1
        wo = (Ws - 1) // cfg['stride'] + 1
        expected_shape = (B, EXPANSION * cfg['planes'], ho, wo)
        assert out.shape == expected_shape, (out.shape, expected_shape)
        assert bool(jnp.all(jnp.isfinite(out)))

        ref = bottleneck_ref(raw, x)
        err = float(jnp.max(jnp.abs(out - ref)))
        scale = float(jnp.max(jnp.abs(ref))) + 1e-6
        assert err <= 0.1 * scale, (err, scale)   # bf16-matmul tolerance

    print("KERNEL_OK")
</pallas_src>

<mosaic_0001>
module attributes {stable_mosaic.version = 11 : i64} {
  func.func @_mm_fused_kernel(%arg0: i32, %arg1: i32, %arg2: memref<512x128xbf16, #tpu.memory_space<vmem>>, %arg3: memref<128x128xbf16, #tpu.memory_space<vmem>>, %arg4: memref<1x128xf32, #tpu.memory_space<vmem>>, %arg5: memref<1x128xf32, #tpu.memory_space<vmem>>, %arg6: memref<512x128xbf16, #tpu.memory_space<vmem>>) attributes {dimension_semantics = [#tpu.dimension_semantics<parallel>, #tpu.dimension_semantics<parallel>], iteration_bounds = array<i64: 1, 1>, scalar_prefetch = 0 : i64, scratch_operands = 0 : i64, tpu.core_type = #tpu.core_type<tc>, window_params = [{transform_indices = @transform_0, window_bounds = array<i64: 512, 128>}, {transform_indices = @transform_1, window_bounds = array<i64: 128, 128>}, {transform_indices = @transform_2, window_bounds = array<i64: 1, 128>}, {transform_indices = @transform_3, window_bounds = array<i64: 1, 128>}, {transform_indices = @transform_4, window_bounds = array<i64: 512, 128>}]} {
    %c0 = arith.constant 0 : index
    %c0_0 = arith.constant 0 : index
    %0 = vector.load %arg2[%c0, %c0_0] : memref<512x128xbf16, #tpu.memory_space<vmem>>, vector<512x128xbf16>
    %c0_1 = arith.constant 0 : index
    %c0_2 = arith.constant 0 : index
    %1 = vector.load %arg3[%c0_1, %c0_2] : memref<128x128xbf16, #tpu.memory_space<vmem>>, vector<128x128xbf16>
    %cst = arith.constant dense<0.000000e+00> : vector<512x128xf32>
    %2 = tpu.matmul %0, %1, %cst {dimension_numbers = #tpu.dot_dimension_numbers<[1], [0], [0], [1], [0, 0, 1, 1], [], []>} : vector<512x128xbf16>, vector<128x128xbf16>, vector<512x128xf32> -> vector<512x128xf32>
    %c0_3 = arith.constant 0 : index
    %c0_4 = arith.constant 0 : index
    %3 = vector.load %arg4[%c0_3, %c0_4] : memref<1x128xf32, #tpu.memory_space<vmem>>, vector<1x128xf32>
    %4 = vector.broadcast %3 : vector<1x128xf32> to vector<512x128xf32>
    %5 = arith.mulf %2, %4 : vector<512x128xf32>
    %c0_5 = arith.constant 0 : index
    %c0_6 = arith.constant 0 : index
    %6 = vector.load %arg5[%c0_5, %c0_6] : memref<1x128xf32, #tpu.memory_space<vmem>>, vector<1x128xf32>
    %7 = vector.broadcast %6 : vector<1x128xf32> to vector<512x128xf32>
    %8 = arith.addf %5, %7 : vector<512x128xf32>
    %cst_7 = arith.constant 0.000000e+00 : f32
    %9 = vector.broadcast %cst_7 : f32 to vector<512x128xf32>
    %10 = arith.maximumf %8, %9 : vector<512x128xf32>
    %11 = arith.truncf %10 : vector<512x128xf32> to vector<512x128xbf16>
    %c0_8 = arith.constant 0 : index
    %c0_9 = arith.constant 0 : index
    %12 = vector.load %arg6[%c0_8, %c0_9] : memref<512x128xbf16, #tpu.memory_space<vmem>>, vector<512x128xbf16>
    tpu.vector_store %arg6[%c0_8, %c0_9], %11 {strides = array<i32>} : memref<512x128xbf16, #tpu.memory_space<vmem>>, vector<512x128xbf16>,
    return
  }
  func.func @transform_0(%arg0: i32, %arg1: i32) -> (i32, i32) {
    %c0_i32 = arith.constant 0 : i32
    %c0_i32_0 = arith.constant 0 : i32
    return %arg0, %c0_i32 : i32, i32
  }
  func.func @transform_1(%arg0: i32, %arg1: i32) -> (i32, i32) {
    %c0_i32 = arith.constant 0 : i32
    %c0_i32_0 = arith.constant 0 : i32
    return %c0_i32, %arg1 : i32, i32
  }
  func.func @transform_2(%arg0: i32, %arg1: i32) -> (i32, i32) {
    %c0_i32 = arith.constant 0 : i32
    %c0_i32_0 = arith.constant 0 : i32
    return %c0_i32, %arg1 : i32, i32
  }
  func.func @transform_3(%arg0: i32, %arg1: i32) -> (i32, i32) {
    %c0_i32 = arith.constant 0 : i32
    %c0_i32_0 = arith.constant 0 : i32
    return %c0_i32, %arg1 : i32, i32
  }
  func.func @transform_4(%arg0: i32, %arg1: i32) -> (i32, i32) {
    %c0_i32 = arith.constant 0 : i32
    return %arg0, %arg1 : i32, i32
  }
}

</mosaic_0001>

<bundles_post_ra>
// kernel: tpu_custom_call.1
= control target key start
LH: loop header
LB: loop body
LE: loop exit
PB: predicated region body
PF: predicated region fallthrough
CT: control target
= control target key end

     0   :  { %9 = vsyncpa [#allocation3], 0  ;;  %s1573_s0 = inlined_call_operand.hbm [shape: bf16[512,128], index: 0, kind: input, shape index: {}]   ;;  %s1574_s1 = inlined_call_operand.hbm [shape: bf16[128,128], index: 1, kind: input, shape index: {}]   ;;  %s1575_s2 = inlined_call_operand.vmem [shape: f32[1,128], index: 2, kind: input, shape index: {}]   ;;  %s1576_s3 = inlined_call_operand.vmem [shape: f32[1,128], index: 3, kind: input, shape index: {}]   ;;  %s1577_s4 = inlined_call_operand.hbm [shape: bf16[512,128], index: 4, kind: output, shape index: {}]  }
   0x1   :  { %10 = vsyncpa [#allocation6], 0 }
   0x2   :  { %11 = vsyncpa [#allocation4], 0  ;;  %s16_s17 = sshll.u32 %s1573_s0, 4  ;;  %s1387_s18 = smov [#allocation2]   ;;  %s17_s17 = int_to_ptr.hbm [resolvable:$true] %s16_s17 }
   0x3   :  { %s18_s19 = sshll.u32 %s1387_s18, 4  ;;  %s29_s22 = sshll.u32 %s1574_s1, 4  ;;  %s19_s19 = int_to_ptr.vmem [resolvable:$true] %s18_s19  ;;  %s30_s22 = int_to_ptr.hbm [resolvable:$true] %s29_s22 }
   0x4   :  { %s1388_s23 = smov 64   ;;  %s1389_s24 = smov 4  }
   0x5   :  { %24 = dma.hbm_to_vmem [thread:$0]  %s17_s17, 4096, %s19_s19, [#allocation3], %s1388_s23, %s1388_s23, %s1389_s24  }
   0x6   :  { %s1390_s25 = smov [#allocation5]  }
   0x7   :  { %s31_s26 = sshll.u32 %s1390_s25, 4  ;;  %s32_s26 = int_to_ptr.vmem [resolvable:$true] %s31_s26 }
   0x8   :  { %37 = dma.hbm_to_vmem [thread:$0]  %s30_s22, 1024, %s32_s26, [#allocation6], %s1388_s23, %s1388_s23, %s1389_s24  }
   0x9   :  { %1381 = dma.done.wait [#allocation3], 4096  }
   0xa   :  { %1382 = vsyncadd [#allocation3], 4294963200 }
   0xb   :  { %1383 = dma.done.wait [#allocation6], 1024  }
   0xc   :  { %1384 = vsyncadd [#allocation6], 4294966272  ;;  %v1086_v0 = vld [vmem:[#allocation5 + $0x38] sm:$0xff]  ;;  %v1085_v1 = vld [vmem:[#allocation5 + $0x30] sm:$0xff]  ;;  %s873_s5 = sshll.u32 %s1577_s4, 4  ;;  %s874_s5 = int_to_ptr.hbm [resolvable:$true] %s873_s5 }
   0xd   :  { %370 = vmatpush.bf16.msra.mxu0 %v1086_v0  ;;  %1278 = vmatpush.bf16.msra.mxu1 %v1086_v0  ;;  %v1084_v2 = vld [vmem:[#allocation5 + $0x28] sm:$0xff]  ;;  %v1083_v3 = vld [vmem:[#allocation5 + $0x20] sm:$0xff]  ;;  %v1082_v4 = vld [vmem:[#allocation5 + $0x18] sm:$0xff] }
   0xe   :  { %1279 = vmatpush.bf16.msra.mxu2 %v1086_v0  ;;  %1280 = vmatpush.bf16.msra.mxu3 %v1086_v0  ;;  %v1081_v5 = vld [vmem:[#allocation5 + $0x10] sm:$0xff]  ;;  %v1080_v6 = vld [vmem:[#allocation5 + $0x8] sm:$0xff]  ;;  %v1079_v7 = vld [vmem:[#allocation5] sm:$0xff] }
   0xf   :  { %v1047_v8 = vld [vmem:[#allocation2] sm:$0xff]  ;;  %v1048_v12 = vld [vmem:[#allocation2 + $0x8] sm:$0xff]  ;;  %v1049_v16 = vld [vmem:[#allocation2 + $0x10] sm:$0xff] }
  0x10   :  { %v1055_v9 = vld [vmem:[#allocation2 + $0x40] sm:$0xff]  ;;  %v1056_v13 = vld [vmem:[#allocation2 + $0x48] sm:$0xff]  ;;  %v1057_v17 = vld [vmem:[#allocation2 + $0x50] sm:$0xff] }
  0x11   :  { %371 = vmatpush.bf16.msra.mxu0 %v1085_v1  ;;  %1281 = vmatpush.bf16.msra.mxu1 %v1085_v1  ;;  %v1063_v10 = vld [vmem:[#allocation2 + $0x80] sm:$0xff]  ;;  %v1064_v14 = vld [vmem:[#allocation2 + $0x88] sm:$0xff]  ;;  %v1065_v18 = vld [vmem:[#allocation2 + $0x90] sm:$0xff] }
  0x12   :  { %1282 = vmatpush.bf16.msra.mxu2 %v1085_v1  ;;  %1283 = vmatpush.bf16.msra.mxu3 %v1085_v1  ;;  %v1071_v11 = vld [vmem:[#allocation2 + $0xc0] sm:$0xff]  ;;  %v1072_v15 = vld [vmem:[#allocation2 + $0xc8] sm:$0xff]  ;;  %v1073_v19 = vld [vmem:[#allocation2 + $0xd0] sm:$0xff] }
  0x13   :  { %v1050_v20 = vld [vmem:[#allocation2 + $0x18] sm:$0xff]  ;;  %v1051_v24 = vld [vmem:[#allocation2 + $0x20] sm:$0xff]  ;;  %v1052_v28 = vld [vmem:[#allocation2 + $0x28] sm:$0xff] }
  0x14   :  { %v1058_v21 = vld [vmem:[#allocation2 + $0x58] sm:$0xff]  ;;  %v1059_v25 = vld [vmem:[#allocation2 + $0x60] sm:$0xff]  ;;  %v1060_v29 = vld [vmem:[#allocation2 + $0x68] sm:$0xff] }
  0x15   :  { %372 = vmatpush.bf16.msra.mxu0 %v1084_v2  ;;  %1284 = vmatpush.bf16.msra.mxu1 %v1084_v2  ;;  %v1066_v22 = vld [vmem:[#allocation2 + $0x98] sm:$0xff]  ;;  %v1067_v26 = vld [vmem:[#allocation2 + $0xa0] sm:$0xff]  ;;  %v1068_v30 = vld [vmem:[#allocation2 + $0xa8] sm:$0xff] }
  0x16   :  { %1285 = vmatpush.bf16.msra.mxu2 %v1084_v2  ;;  %1286 = vmatpush.bf16.msra.mxu3 %v1084_v2  ;;  %v1074_v23 = vld [vmem:[#allocation2 + $0xd8] sm:$0xff]  ;;  %v1075_v27 = vld [vmem:[#allocation2 + $0xe0] sm:$0xff]  ;;  %v1076_v31 = vld [vmem:[#allocation2 + $0xe8] sm:$0xff] }
  0x17   :  { %v1053_v32 = vld [vmem:[#allocation2 + $0x30] sm:$0xff]  ;;  %v1054_v36 = vld [vmem:[#allocation2 + $0x38] sm:$0xff]  ;;  %v1432_v42 = vld [vmem:[%s1575_s2] ss:$0 sm:$0xff]  ;;  %s1391_s2 = smov [#allocation7]  }
  0x18   :  { %v1061_v33 = vld [vmem:[#allocation2 + $0x70] sm:$0xff]  ;;  %v1062_v37 = vld [vmem:[#allocation2 + $0x78] sm:$0xff]  ;;  %v1438_v44 = vld [vmem:[%s1576_s3] ss:$0 sm:$0xff]  ;;  %s871_s3 = sshll.u32 %s1391_s2, 4  ;;  %s872_s3 = int_to_ptr.vmem [resolvable:$true] %s871_s3 }
  0x19   :  { %373 = vmatpush.bf16.msra.mxu0 %v1083_v3  ;;  %1287 = vmatpush.bf16.msra.mxu1 %v1083_v3  ;;  %v1069_v34 = vld [vmem:[#allocation2 + $0xb0] sm:$0xff]  ;;  %v1070_v38 = vld [vmem:[#allocation2 + $0xb8] sm:$0xff] }
  0x1a   :  { %1288 = vmatpush.bf16.msra.mxu2 %v1083_v3  ;;  %1289 = vmatpush.bf16.msra.mxu3 %v1083_v3  ;;  %v1077_v35 = vld [vmem:[#allocation2 + $0xf0] sm:$0xff]  ;;  %v1078_v39 = vld [vmem:[#allocation2 + $0xf8] sm:$0xff] }
  0x1d   :  { %374 = vmatpush.bf16.msra.mxu0 %v1082_v4  ;;  %1290 = vmatpush.bf16.msra.mxu1 %v1082_v4 }
  0x1e   :  { %1291 = vmatpush.bf16.msra.mxu2 %v1082_v4  ;;  %1292 = vmatpush.bf16.msra.mxu3 %v1082_v4 }
  0x21   :  { %375 = vmatpush.bf16.msra.mxu0 %v1081_v5  ;;  %1293 = vmatpush.bf16.msra.mxu1 %v1081_v5 }
  0x22   :  { %1294 = vmatpush.bf16.msra.mxu2 %v1081_v5  ;;  %1295 = vmatpush.bf16.msra.mxu3 %v1081_v5 }
  0x25   :  { %376 = vmatpush.bf16.msra.mxu0 %v1080_v6  ;;  %1296 = vmatpush.bf16.msra.mxu1 %v1080_v6 }
  0x26   :  { %1297 = vmatpush.bf16.msra.mxu2 %v1080_v6  ;;  %1298 = vmatpush.bf16.msra.mxu3 %v1080_v6 }
  0x29   :  { %377 = vmatpush.bf16.msra.mxu0 %v1079_v7  ;;  %1299 = vmatpush.bf16.msra.mxu1 %v1079_v7 }
  0x2a   :  { %1300 = vmatpush.bf16.msra.mxu2 %v1079_v7  ;;  %1301 = vmatpush.bf16.msra.mxu3 %v1079_v7 }
  0x2c   :  { %378 = vmatmul.bf16.vlgmr.msra.gmra.mxu0 %v1047_v8  ;;  %418 = vmatmul.bf16.vlgmr.msra.gmra.mxu1 %v1055_v9 }
  0x2d   :  { %458 = vmatmul.bf16.vlgmr.msra.gmra.mxu2 %v1063_v10  ;;  %498 = vmatmul.bf16.vlgmr.msra.gmra.mxu3 %v1071_v11 }
  0x3c   :  { %383 = vmatmul.bf16.gmra.mxu0 %v1048_v12  ;;  %423 = vmatmul.bf16.gmra.mxu1 %v1056_v13 }
  0x3d   :  { %463 = vmatmul.bf16.gmra.mxu2 %v1064_v14  ;;  %503 = vmatmul.bf16.gmra.mxu3 %v1072_v15 }
  0x4c   :  { %388 = vmatmul.bf16.gmra.mxu0 %v1049_v16  ;;  %428 = vmatmul.bf16.gmra.mxu1 %v1057_v17 }
  0x4d   :  { %468 = vmatmul.bf16.gmra.mxu2 %v1065_v18  ;;  %508 = vmatmul.bf16.gmra.mxu3 %v1073_v19 }
  0x5c   :  { %393 = vmatmul.bf16.gmra.mxu0 %v1050_v20  ;;  %433 = vmatmul.bf16.gmra.mxu1 %v1058_v21 }
  0x5d   :  { %473 = vmatmul.bf16.gmra.mxu2 %v1066_v22  ;;  %513 = vmatmul.bf16.gmra.mxu3 %v1074_v23 }
  0x6c   :  { %398 = vmatmul.bf16.gmra.mxu0 %v1051_v24  ;;  %438 = vmatmul.bf16.gmra.mxu1 %v1059_v25 }
  0x6d   :  { %478 = vmatmul.bf16.gmra.mxu2 %v1067_v26  ;;  %518 = vmatmul.bf16.gmra.mxu3 %v1075_v27 }
  0x7c   :  { %403 = vmatmul.bf16.gmra.mxu0 %v1052_v28  ;;  %443 = vmatmul.bf16.gmra.mxu1 %v1060_v29 }
  0x7d   :  { %483 = vmatmul.bf16.gmra.mxu2 %v1068_v30  ;;  %523 = vmatmul.bf16.gmra.mxu3 %v1076_v31 }
  0x8c   :  { %408 = vmatmul.bf16.gmra.mxu0 %v1053_v32  ;;  %448 = vmatmul.bf16.gmra.mxu1 %v1061_v33 }
  0x8d   :  { %488 = vmatmul.bf16.gmra.mxu2 %v1069_v34  ;;  %528 = vmatmul.bf16.gmra.mxu3 %v1077_v35 }
  0x9c   :  { %413 = vmatmul.bf16.gmra.mxu0 %v1054_v36  ;;  %453 = vmatmul.bf16.gmra.mxu1 %v1062_v37 }
  0x9d   :  { %493 = vmatmul.bf16.gmra.mxu2 %v1070_v38  ;;  %533 = vmatmul.bf16.gmra.mxu3 %v1078_v39 }
  0xa9   :  { %v379_v40 = vpop.f32.mrf.mxu0  ;;  %v419_v41 = vpop.f32.mrf.mxu1 }
  0xaa   :  { %v543_v43 = vmul.f32 %v1432_v42, %v379_v40  ;;  %v559_v45 = vmul.f32 %v1432_v42, %v419_v41 }
  0xac   :  { %v611_v50 = vadd.f32 %v1438_v44, %v543_v43  ;;  %v627_v51 = vadd.f32 %v1438_v44, %v559_v45 }
  0xae   :  { %v675_v58 = vmax.f32 %v611_v50, 0.0  ;;  %v691_v59 = vmax.f32 %v627_v51, 0.0 }
  0xb0   :  { %v459_v46 = vpop.f32.mrf.mxu2  ;;  %v499_v47 = vpop.f32.mrf.mxu3 }
  0xb1   :  { %v381_v48 = vpop.f32.mrf.mxu0  ;;  %v421_v49 = vpop.f32.mrf.mxu1  ;;  %v575_v56 = vmul.f32 %v1432_v42, %v459_v46  ;;  %v591_v57 = vmul.f32 %v1432_v42, %v499_v47 }
  0xb2   :  { %v544_v52 = vmul.f32 %v1432_v42, %v381_v48  ;;  %v560_v53 = vmul.f32 %v1432_v42, %v421_v49 }
  0xb3   :  { %v643_v2 = vadd.f32 %v1438_v44, %v575_v56  ;;  %v659_v3 = vadd.f32 %v1438_v44, %v591_v57 }
  0xb4   :  { %v612_v54 = vadd.f32 %v1438_v44, %v544_v52  ;;  %v628_v55 = vadd.f32 %v1438_v44, %v560_v53 }
  0xb5   :  { %v707_v10 = vmax.f32 %v643_v2, 0.0  ;;  %v723_v11 = vmax.f32 %v659_v3, 0.0 }
  0xb6   :  { %v676_v60 = vmax.f32 %v612_v54, 0.0  ;;  %v692_v61 = vmax.f32 %v628_v55, 0.0 }
  0xb8   :  { %v1090_v62 = vpack.c.bf16 %v676_v60, %v675_v58  ;;  %v1130_v63 = vpack.c.bf16 %v692_v61, %v691_v59  ;;  %v461_v0 = vpop.f32.mrf.mxu2  ;;  %v501_v1 = vpop.f32.mrf.mxu3 }
  0xb9   :  { %v576_v4 = vmul.f32 %v1432_v42, %v461_v0  ;;  %v592_v5 = vmul.f32 %v1432_v42, %v501_v1  ;;  %v384_v6 = vpop.f32.mrf.mxu0  ;;  %v424_v7 = vpop.f32.mrf.mxu1 }
  0xba   :  { %1091 = vst [vmem:[#allocation7] sm:$0xff] %v1090_v62   ;;  %v545_v14 = vmul.f32 %v1432_v42, %v384_v6  ;;  %v561_v15 = vmul.f32 %v1432_v42, %v424_v7 }
  0xbb   :  { %1254 = vst [vmem:[#allocation7 + $0x40] sm:$0xff] %v1130_v63   ;;  %v644_v8 = vadd.f32 %v1438_v44, %v576_v4  ;;  %v660_v9 = vadd.f32 %v1438_v44, %v592_v5 }
  0xbc   :  { %v613_v22 = vadd.f32 %v1438_v44, %v545_v14  ;;  %v629_v23 = vadd.f32 %v1438_v44, %v561_v15 }
  0xbd   :  { %v708_v12 = vmax.f32 %v644_v8, 0.0  ;;  %v724_v13 = vmax.f32 %v660_v9, 0.0 }
  0xbe   :  { %v677_v30 = vmax.f32 %v613_v22, 0.0  ;;  %v693_v31 = vmax.f32 %v629_v23, 0.0 }
  0xbf   :  { %v1170_v16 = vpack.c.bf16 %v708_v12, %v707_v10  ;;  %v1210_v17 = vpack.c.bf16 %v724_v13, %v723_v11 }
  0xc0   :  { %v464_v18 = vpop.f32.mrf.mxu2  ;;  %v504_v19 = vpop.f32.mrf.mxu3 }
  0xc1   :  { %1262 = vst [vmem:[#allocation7 + $0x80] sm:$0xff] %v1170_v16   ;;  %v386_v20 = vpop.f32.mrf.mxu0  ;;  %v426_v21 = vpop.f32.mrf.mxu1  ;;  %v577_v28 = vmul.f32 %v1432_v42, %v464_v18  ;;  %v593_v29 = vmul.f32 %v1432_v42, %v504_v19 }
  0xc2   :  { %1270 = vst [vmem:[#allocation7 + $0xc0] sm:$0xff] %v1210_v17   ;;  %v546_v24 = vmul.f32 %v1432_v42, %v386_v20  ;;  %v562_v25 = vmul.f32 %v1432_v42, %v426_v21 }
  0xc3   :  { %v645_v38 = vadd.f32 %v1438_v44, %v577_v28  ;;  %v661_v39 = vadd.f32 %v1438_v44, %v593_v29 }
  0xc4   :  { %v614_v26 = vadd.f32 %v1438_v44, %v546_v24  ;;  %v630_v27 = vadd.f32 %v1438_v44, %v562_v25 }
  0xc5   :  { %v709_v48 = vmax.f32 %v645_v38, 0.0  ;;  %v725_v49 = vmax.f32 %v661_v39, 0.0 }
  0xc6   :  { %v678_v32 = vmax.f32 %v614_v26, 0.0  ;;  %v694_v33 = vmax.f32 %v630_v27, 0.0 }
  0xc8   :  { %v1095_v34 = vpack.c.bf16 %v678_v32, %v677_v30  ;;  %v1135_v35 = vpack.c.bf16 %v694_v33, %v693_v31  ;;  %v466_v36 = vpop.f32.mrf.mxu2  ;;  %v506_v37 = vpop.f32.mrf.mxu3 }
  0xc9   :  { %v578_v40 = vmul.f32 %v1432_v42, %v466_v36  ;;  %v594_v41 = vmul.f32 %v1432_v42, %v506_v37  ;;  %v389_v43 = vpop.f32.mrf.mxu0  ;;  %v429_v45 = vpop.f32.mrf.mxu1 }
  0xca   :  { %1247 = vst [vmem:[#allocation7 + $0x8] sm:$0xff] %v1095_v34   ;;  %v547_v52 = vmul.f32 %v1432_v42, %v389_v43  ;;  %v563_v53 = vmul.f32 %v1432_v42, %v429_v45 }
  0xcb   :  { %1255 = vst [vmem:[#allocation7 + $0x48] sm:$0xff] %v1135_v35   ;;  %v646_v46 = vadd.f32 %v1438_v44, %v578_v40  ;;  %v662_v47 = vadd.f32 %v1438_v44, %v594_v41 }
  0xcc   :  { %v615_v60 = vadd.f32 %v1438_v44, %v547_v52  ;;  %v631_v61 = vadd.f32 %v1438_v44, %v563_v53 }
  0xcd   :  { %v710_v50 = vmax.f32 %v646_v46, 0.0  ;;  %v726_v51 = vmax.f32 %v662_v47, 0.0 }
  0xce   :  { %v679_v4 = vmax.f32 %v615_v60, 0.0  ;;  %v695_v5 = vmax.f32 %v631_v61, 0.0 }
  0xcf   :  { %v1175_v54 = vpack.c.bf16 %v710_v50, %v709_v48  ;;  %v1215_v55 = vpack.c.bf16 %v726_v51, %v725_v49 }
  0xd0   :  { %v469_v56 = vpop.f32.mrf.mxu2  ;;  %v509_v57 = vpop.f32.mrf.mxu3 }
  0xd1   :  { %1263 = vst [vmem:[#allocation7 + $0x88] sm:$0xff] %v1175_v54   ;;  %v391_v58 = vpop.f32.mrf.mxu0  ;;  %v431_v59 = vpop.f32.mrf.mxu1  ;;  %v579_v2 = vmul.f32 %v1432_v42, %v469_v56  ;;  %v595_v3 = vmul.f32 %v1432_v42, %v509_v57 }
  0xd2   :  { %1271 = vst [vmem:[#allocation7 + $0xc8] sm:$0xff] %v1215_v55   ;;  %v548_v62 = vmul.f32 %v1432_v42, %v391_v58  ;;  %v564_v63 = vmul.f32 %v1432_v42, %v431_v59 }
  0xd3   :  { %v647_v12 = vadd.f32 %v1438_v44, %v579_v2  ;;  %v663_v13 = vadd.f32 %v1438_v44, %v595_v3 }
  0xd4   :  { %v616_v0 = vadd.f32 %v1438_v44, %v548_v62  ;;  %v632_v1 = vadd.f32 %v1438_v44, %v564_v63 }
  0xd5   :  { %v711_v20 = vmax.f32 %v647_v12, 0.0  ;;  %v727_v21 = vmax.f32 %v663_v13, 0.0 }
  0xd6   :  { %v680_v6 = vmax.f32 %v616_v0, 0.0  ;;  %v696_v7 = vmax.f32 %v632_v1, 0.0 }
  0xd8   :  { %v1100_v8 = vpack.c.bf16 %v680_v6, %v679_v4  ;;  %v1140_v9 = vpack.c.bf16 %v696_v7, %v695_v5  ;;  %v471_v10 = vpop.f32.mrf.mxu2  ;;  %v511_v11 = vpop.f32.mrf.mxu3 }
  0xd9   :  { %v580_v14 = vmul.f32 %v1432_v42, %v471_v10  ;;  %v596_v15 = vmul.f32 %v1432_v42, %v511_v11  ;;  %v394_v16 = vpop.f32.mrf.mxu0  ;;  %v434_v17 = vpop.f32.mrf.mxu1 }
  0xda   :  { %1248 = vst [vmem:[#allocation7 + $0x10] sm:$0xff] %v1100_v8   ;;  %v549_v24 = vmul.f32 %v1432_v42, %v394_v16  ;;  %v565_v25 = vmul.f32 %v1432_v42, %v434_v17 }
  0xdb   :  { %1256 = vst [vmem:[#allocation7 + $0x50] sm:$0xff] %v1140_v9   ;;  %v648_v18 = vadd.f32 %v1438_v44, %v580_v14  ;;  %v664_v19 = vadd.f32 %v1438_v44, %v596_v15 }
  0xdc   :  { %v617_v32 = vadd.f32 %v1438_v44, %v549_v24  ;;  %v633_v33 = vadd.f32 %v1438_v44, %v565_v25 }
  0xdd   :  { %v712_v22 = vmax.f32 %v648_v18, 0.0  ;;  %v728_v23 = vmax.f32 %v664_v19, 0.0 }
  0xde   :  { %v681_v40 = vmax.f32 %v617_v32, 0.0  ;;  %v697_v41 = vmax.f32 %v633_v33, 0.0 }
  0xdf   :  { %v1180_v26 = vpack.c.bf16 %v712_v22, %v711_v20  ;;  %v1220_v27 = vpack.c.bf16 %v728_v23, %v727_v21 }
  0xe0   :  { %v474_v28 = vpop.f32.mrf.mxu2  ;;  %v514_v29 = vpop.f32.mrf.mxu3 }
  0xe1   :  { %1264 = vst [vmem:[#allocation7 + $0x90] sm:$0xff] %v1180_v26   ;;  %v396_v30 = vpop.f32.mrf.mxu0  ;;  %v436_v31 = vpop.f32.mrf.mxu1  ;;  %v581_v38 = vmul.f32 %v1432_v42, %v474_v28  ;;  %v597_v39 = vmul.f32 %v1432_v42, %v514_v29 }
  0xe2   :  { %1272 = vst [vmem:[#allocation7 + $0xd0] sm:$0xff] %v1220_v27   ;;  %v550_v34 = vmul.f32 %v1432_v42, %v396_v30  ;;  %v566_v35 = vmul.f32 %v1432_v42, %v436_v31 }
  0xe3   :  { %v649_v50 = vadd.f32 %v1438_v44, %v581_v38  ;;  %v665_v51 = vadd.f32 %v1438_v44, %v597_v39 }
  0xe4   :  { %v618_v36 = vadd.f32 %v1438_v44, %v550_v34  ;;  %v634_v37 = vadd.f32 %v1438_v44, %v566_v35 }
  0xe5   :  { %v713_v58 = vmax.f32 %v649_v50, 0.0  ;;  %v729_v59 = vmax.f32 %v665_v51, 0.0 }
  0xe6   :  { %v682_v43 = vmax.f32 %v618_v36, 0.0  ;;  %v698_v45 = vmax.f32 %v634_v37, 0.0 }
  0xe8   :  { %v1105_v46 = vpack.c.bf16 %v682_v43, %v681_v40  ;;  %v1145_v47 = vpack.c.bf16 %v698_v45, %v697_v41  ;;  %v476_v48 = vpop.f32.mrf.mxu2  ;;  %v516_v49 = vpop.f32.mrf.mxu3 }
  0xe9   :  { %v582_v52 = vmul.f32 %v1432_v42, %v476_v48  ;;  %v598_v53 = vmul.f32 %v1432_v42, %v516_v49  ;;  %v399_v54 = vpop.f32.mrf.mxu0  ;;  %v439_v55 = vpop.f32.mrf.mxu1 }
  0xea   :  { %1249 = vst [vmem:[#allocation7 + $0x18] sm:$0xff] %v1105_v46   ;;  %v551_v62 = vmul.f32 %v1432_v42, %v399_v54  ;;  %v567_v63 = vmul.f32 %v1432_v42, %v439_v55 }
  0xeb   :  { %1257 = vst [vmem:[#allocation7 + $0x58] sm:$0xff] %v1145_v47   ;;  %v650_v56 = vadd.f32 %v1438_v44, %v582_v52  ;;  %v666_v57 = vadd.f32 %v1438_v44, %v598_v53 }
  0xec   :  { %v619_v6 = vadd.f32 %v1438_v44, %v551_v62  ;;  %v635_v7 = vadd.f32 %v1438_v44, %v567_v63 }
  0xed   :  { %v714_v60 = vmax.f32 %v650_v56, 0.0  ;;  %v730_v61 = vmax.f32 %v666_v57, 0.0 }
  0xee   :  { %v683_v14 = vmax.f32 %v619_v6, 0.0  ;;  %v699_v15 = vmax.f32 %v635_v7, 0.0 }
  0xef   :  { %v1185_v0 = vpack.c.bf16 %v714_v60, %v713_v58  ;;  %v1225_v1 = vpack.c.bf16 %v730_v61, %v729_v59 }
  0xf0   :  { %v479_v2 = vpop.f32.mrf.mxu2  ;;  %v519_v3 = vpop.f32.mrf.mxu3 }
  0xf1   :  { %1265 = vst [vmem:[#allocation7 + $0x98] sm:$0xff] %v1185_v0   ;;  %v401_v4 = vpop.f32.mrf.mxu0  ;;  %v441_v5 = vpop.f32.mrf.mxu1  ;;  %v583_v12 = vmul.f32 %v1432_v42, %v479_v2  ;;  %v599_v13 = vmul.f32 %v1432_v42, %v519_v3 }
  0xf2   :  { %1273 = vst [vmem:[#allocation7 + $0xd8] sm:$0xff] %v1225_v1   ;;  %v552_v8 = vmul.f32 %v1432_v42, %v401_v4  ;;  %v568_v9 = vmul.f32 %v1432_v42, %v441_v5 }
  0xf3   :  { %v651_v22 = vadd.f32 %v1438_v44, %v583_v12  ;;  %v667_v23 = vadd.f32 %v1438_v44, %v599_v13 }
  0xf4   :  { %v620_v10 = vadd.f32 %v1438_v44, %v552_v8  ;;  %v636_v11 = vadd.f32 %v1438_v44, %v568_v9 }
  0xf5   :  { %v715_v30 = vmax.f32 %v651_v22, 0.0  ;;  %v731_v31 = vmax.f32 %v667_v23, 0.0 }
  0xf6   :  { %v684_v16 = vmax.f32 %v620_v10, 0.0  ;;  %v700_v17 = vmax.f32 %v636_v11, 0.0 }
  0xf8   :  { %v1110_v18 = vpack.c.bf16 %v684_v16, %v683_v14  ;;  %v1150_v19 = vpack.c.bf16 %v700_v17, %v699_v15  ;;  %v481_v20 = vpop.f32.mrf.mxu2  ;;  %v521_v21 = vpop.f32.mrf.mxu3 }
  0xf9   :  { %v584_v24 = vmul.f32 %v1432_v42, %v481_v20  ;;  %v600_v25 = vmul.f32 %v1432_v42, %v521_v21  ;;  %v404_v26 = vpop.f32.mrf.mxu0  ;;  %v444_v27 = vpop.f32.mrf.mxu1 }
  0xfa   :  { %1250 = vst [vmem:[#allocation7 + $0x20] sm:$0xff] %v1110_v18   ;;  %v553_v34 = vmul.f32 %v1432_v42, %v404_v26  ;;  %v569_v35 = vmul.f32 %v1432_v42, %v444_v27 }
  0xfb   :  { %1258 = vst [vmem:[#allocation7 + $0x60] sm:$0xff] %v1150_v19   ;;  %v652_v28 = vadd.f32 %v1438_v44, %v584_v24  ;;  %v668_v29 = vadd.f32 %v1438_v44, %v600_v25 }
  0xfc   :  { %v621_v43 = vadd.f32 %v1438_v44, %v553_v34  ;;  %v637_v45 = vadd.f32 %v1438_v44, %v569_v35 }
  0xfd   :  { %v716_v32 = vmax.f32 %v652_v28, 0.0  ;;  %v732_v33 = vmax.f32 %v668_v29, 0.0 }
  0xfe   :  { %v685_v52 = vmax.f32 %v621_v43, 0.0  ;;  %v701_v53 = vmax.f32 %v637_v45, 0.0 }
  0xff   :  { %v1190_v36 = vpack.c.bf16 %v716_v32, %v715_v30  ;;  %v1230_v37 = vpack.c.bf16 %v732_v33, %v731_v31 }
 0x100   :  { %v484_v38 = vpop.f32.mrf.mxu2  ;;  %v524_v39 = vpop.f32.mrf.mxu3 }
 0x101   :  { %1266 = vst [vmem:[#allocation7 + $0xa0] sm:$0xff] %v1190_v36   ;;  %v406_v40 = vpop.f32.mrf.mxu0  ;;  %v446_v41 = vpop.f32.mrf.mxu1  ;;  %v585_v50 = vmul.f32 %v1432_v42, %v484_v38  ;;  %v601_v51 = vmul.f32 %v1432_v42, %v524_v39 }
 0x102   :  { %1274 = vst [vmem:[#allocation7 + $0xe0] sm:$0xff] %v1230_v37   ;;  %v554_v46 = vmul.f32 %v1432_v42, %v406_v40  ;;  %v570_v47 = vmul.f32 %v1432_v42, %v446_v41 }
 0x103   :  { %v653_v60 = vadd.f32 %v1438_v44, %v585_v50  ;;  %v669_v61 = vadd.f32 %v1438_v44, %v601_v51 }
 0x104   :  { %v622_v48 = vadd.f32 %v1438_v44, %v554_v46  ;;  %v638_v49 = vadd.f32 %v1438_v44, %v570_v47 }
 0x105   :  { %v717_v4 = vmax.f32 %v653_v60, 0.0  ;;  %v733_v5 = vmax.f32 %v669_v61, 0.0 }
 0x106   :  { %v686_v54 = vmax.f32 %v622_v48, 0.0  ;;  %v702_v55 = vmax.f32 %v638_v49, 0.0 }
 0x108   :  { %v1115_v56 = vpack.c.bf16 %v686_v54, %v685_v52  ;;  %v1155_v57 = vpack.c.bf16 %v702_v55, %v701_v53  ;;  %v486_v58 = vpop.f32.mrf.mxu2  ;;  %v526_v59 = vpop.f32.mrf.mxu3 }
 0x109   :  { %v586_v62 = vmul.f32 %v1432_v42, %v486_v58  ;;  %v602_v63 = vmul.f32 %v1432_v42, %v526_v59  ;;  %v409_v0 = vpop.f32.mrf.mxu0  ;;  %v449_v1 = vpop.f32.mrf.mxu1 }
 0x10a   :  { %1251 = vst [vmem:[#allocation7 + $0x28] sm:$0xff] %v1115_v56   ;;  %v555_v8 = vmul.f32 %v1432_v42, %v409_v0  ;;  %v571_v9 = vmul.f32 %v1432_v42, %v449_v1 }
 0x10b   :  { %1259 = vst [vmem:[#allocation7 + $0x68] sm:$0xff] %v1155_v57   ;;  %v654_v2 = vadd.f32 %v1438_v44, %v586_v62  ;;  %v670_v3 = vadd.f32 %v1438_v44, %v602_v63 }
 0x10c   :  { %v623_v16 = vadd.f32 %v1438_v44, %v555_v8  ;;  %v639_v17 = vadd.f32 %v1438_v44, %v571_v9 }
 0x10d   :  { %v718_v6 = vmax.f32 %v654_v2, 0.0  ;;  %v734_v7 = vmax.f32 %v670_v3, 0.0 }
 0x10e   :  { %v687_v24 = vmax.f32 %v623_v16, 0.0  ;;  %v703_v25 = vmax.f32 %v639_v17, 0.0 }
 0x10f   :  { %v1195_v10 = vpack.c.bf16 %v718_v6, %v717_v4  ;;  %v1235_v11 = vpack.c.bf16 %v734_v7, %v733_v5 }
 0x110   :  { %v489_v12 = vpop.f32.mrf.mxu2  ;;  %v529_v13 = vpop.f32.mrf.mxu3 }
 0x111   :  { %1267 = vst [vmem:[#allocation7 + $0xa8] sm:$0xff] %v1195_v10   ;;  %v411_v14 = vpop.f32.mrf.mxu0  ;;  %v451_v15 = vpop.f32.mrf.mxu1  ;;  %v587_v22 = vmul.f32 %v1432_v42, %v489_v12  ;;  %v603_v23 = vmul.f32 %v1432_v42, %v529_v13 }
 0x112   :  { %1275 = vst [vmem:[#allocation7 + $0xe8] sm:$0xff] %v1235_v11   ;;  %v556_v18 = vmul.f32 %v1432_v42, %v411_v14  ;;  %v572_v19 = vmul.f32 %v1432_v42, %v451_v15 }
 0x113   :  { %v655_v32 = vadd.f32 %v1438_v44, %v587_v22  ;;  %v671_v33 = vadd.f32 %v1438_v44, %v603_v23 }
 0x114   :  { %v624_v20 = vadd.f32 %v1438_v44, %v556_v18  ;;  %v640_v21 = vadd.f32 %v1438_v44, %v572_v19 }
 0x115   :  { %v719_v40 = vmax.f32 %v655_v32, 0.0  ;;  %v735_v41 = vmax.f32 %v671_v33, 0.0 }
 0x116   :  { %v688_v26 = vmax.f32 %v624_v20, 0.0  ;;  %v704_v27 = vmax.f32 %v640_v21, 0.0 }
 0x118   :  { %v1120_v28 = vpack.c.bf16 %v688_v26, %v687_v24  ;;  %v1160_v29 = vpack.c.bf16 %v704_v27, %v703_v25  ;;  %v491_v30 = vpop.f32.mrf.mxu2  ;;  %v531_v31 = vpop.f32.mrf.mxu3 }
 0x119   :  { %v588_v34 = vmul.f32 %v1432_v42, %v491_v30  ;;  %v604_v35 = vmul.f32 %v1432_v42, %v531_v31  ;;  %v414_v36 = vpop.f32.mrf.mxu0  ;;  %v454_v37 = vpop.f32.mrf.mxu1 }
 0x11a   :  { %1252 = vst [vmem:[#allocation7 + $0x30] sm:$0xff] %v1120_v28   ;;  %v557_v46 = vmul.f32 %v1432_v42, %v414_v36  ;;  %v573_v47 = vmul.f32 %v1432_v42, %v454_v37 }
 0x11b   :  { %1260 = vst [vmem:[#allocation7 + $0x70] sm:$0xff] %v1160_v29   ;;  %v656_v38 = vadd.f32 %v1438_v44, %v588_v34  ;;  %v672_v39 = vadd.f32 %v1438_v44, %v604_v35 }
 0x11c   :  { %v625_v54 = vadd.f32 %v1438_v44, %v557_v46  ;;  %v641_v55 = vadd.f32 %v1438_v44, %v573_v47 }
 0x11d   :  { %v720_v43 = vmax.f32 %v656_v38, 0.0  ;;  %v736_v45 = vmax.f32 %v672_v39, 0.0 }
 0x11e   :  { %v689_v62 = vmax.f32 %v625_v54, 0.0  ;;  %v705_v63 = vmax.f32 %v641_v55, 0.0 }
 0x11f   :  { %v1200_v48 = vpack.c.bf16 %v720_v43, %v719_v40  ;;  %v1240_v49 = vpack.c.bf16 %v736_v45, %v735_v41 }
 0x120   :  { %v494_v50 = vpop.f32.mrf.mxu2  ;;  %v534_v51 = vpop.f32.mrf.mxu3 }
 0x121   :  { %1268 = vst [vmem:[#allocation7 + $0xb0] sm:$0xff] %v1200_v48   ;;  %v416_v52 = vpop.f32.mrf.mxu0  ;;  %v456_v53 = vpop.f32.mrf.mxu1  ;;  %v589_v60 = vmul.f32 %v1432_v42, %v494_v50  ;;  %v605_v61 = vmul.f32 %v1432_v42, %v534_v51 }
 0x122   :  { %1276 = vst [vmem:[#allocation7 + $0xf0] sm:$0xff] %v1240_v49   ;;  %v558_v56 = vmul.f32 %v1432_v42, %v416_v52  ;;  %v574_v57 = vmul.f32 %v1432_v42, %v456_v53 }
 0x123   :  { %v657_v6 = vadd.f32 %v1438_v44, %v589_v60  ;;  %v673_v7 = vadd.f32 %v1438_v44, %v605_v61 }
 0x124   :  { %v626_v58 = vadd.f32 %v1438_v44, %v558_v56  ;;  %v642_v59 = vadd.f32 %v1438_v44, %v574_v57 }
 0x125   :  { %v721_v12 = vmax.f32 %v657_v6, 0.0  ;;  %v737_v13 = vmax.f32 %v673_v7, 0.0 }
 0x126   :  { %v690_v0 = vmax.f32 %v626_v58, 0.0  ;;  %v706_v1 = vmax.f32 %v642_v59, 0.0 }
 0x128   :  { %v1125_v2 = vpack.c.bf16 %v690_v0, %v689_v62  ;;  %v1165_v3 = vpack.c.bf16 %v706_v1, %v705_v63  ;;  %v496_v4 = vpop.f32.mrf.mxu2  ;;  %v536_v5 = vpop.f32.mrf.mxu3 }
 0x129   :  { %v590_v8 = vmul.f32 %v1432_v42, %v496_v4  ;;  %v606_v9 = vmul.f32 %v1432_v42, %v536_v5 }
 0x12a   :  { %1253 = vst [vmem:[#allocation7 + $0x38] sm:$0xff] %v1125_v2  }
 0x12b   :  { %1261 = vst [vmem:[#allocation7 + $0x78] sm:$0xff] %v1165_v3   ;;  %v658_v10 = vadd.f32 %v1438_v44, %v590_v8  ;;  %v674_v11 = vadd.f32 %v1438_v44, %v606_v9 }
 0x12d   :  { %v722_v14 = vmax.f32 %v658_v10, 0.0  ;;  %v738_v15 = vmax.f32 %v674_v11, 0.0 }
 0x12f   :  { %v1205_v16 = vpack.c.bf16 %v722_v14, %v721_v12  ;;  %v1245_v17 = vpack.c.bf16 %v738_v15, %v737_v13 }
 0x131   :  { %1269 = vst [vmem:[#allocation7 + $0xb8] sm:$0xff] %v1205_v16  }
 0x132   :  { %1277 = vst [vmem:[#allocation7 + $0xf8] sm:$0xff] %v1245_v17  }
 0x133   :  { %879 = dma.vmem_to_hbm [thread:$0]  %s872_s3, 4096, %s874_s5, [#allocation4], %s1388_s23, %s1388_s23, %s1389_s24  }
 0x134   :  { %1385 = dma.done.wait [#allocation4], 4096  }
 0x135   :  { %1386 = vsyncadd [#allocation4], 4294963200 }
 0x136   :  { %884 = vsyncpa [#allocation3], 1 }
 0x137   :  { %885 = vsyncpa [#allocation6], 1 }
 0x138   :  { %886 = vsyncpa [#allocation4], 1 }

</bundles_post_ra>
